<compile_context>
chip_gen: v7x
topology: tpu7x:2x2x1
jax: 0.10.0
libtpu: 0.0.40
codegen_flags: <defaults>
</compile_context>

<pallas_src>
import functools

import jax
import jax.numpy as jnp
from jax import lax
from jax.experimental import pallas as pl
from jax.experimental.pallas import tpu as pltpu


def _round_up(v, m):
    return (v + m - 1) // m * m


# --------------------------- kernels ---------------------------------------


def _transform_kernel(x_ref, w_ref, d_ref, z_ref):
    """Z = D^{-1/2} (X @ W)  (row-local; Z stored bf16 for the bf16 MXU path)."""
    xw = jnp.dot(x_ref[...], w_ref[...], preferred_element_type=jnp.float32)
    z_ref[...] = (d_ref[...] * xw).astype(z_ref.dtype)


def _layer1_fused_kernel(a_ref, z1_ref, d_ref, b1_ref, w2_ref, z2_ref):
    """H1_tile = relu(D^{-1/2}((A+I)_tile @ Z1) + b1);  Z2_tile = D^{-1/2}(H1_tile @ W2).

    The layer-2 feature transform is fused so H1 never leaves VMEM.
    """
    agg = jnp.dot(a_ref[...], z1_ref[...], preferred_element_type=jnp.float32)
    h1 = jnp.maximum(d_ref[...] * agg + b1_ref[...], 0.0)
    z2 = d_ref[...] * jnp.dot(h1, w2_ref[...], preferred_element_type=jnp.float32)
    z2_ref[...] = z2.astype(z2_ref.dtype)


def _layer2_kernel(a_ref, z2_ref, d_ref, b2_ref, h2_ref, *, tile_n, n_valid):
    """H2_tile = D^{-1/2}((A+I)_tile @ Z2) + b2, padded rows zeroed (exact col-norm)."""
    agg = jnp.dot(a_ref[...], z2_ref[...], preferred_element_type=jnp.float32)
    h2 = d_ref[...] * agg + b2_ref[...]
    row = pl.program_id(0) * tile_n + lax.broadcasted_iota(jnp.int32, h2.shape, 0)
    h2_ref[...] = jnp.where(row < n_valid, h2, 0.0)


def _colsumsq_kernel(h_ref, ss_ref):
    """Accumulate per-column sum of squares across row tiles (f32 accumulator)."""

    @pl.when(pl.program_id(0) == 0)
    def _():
        ss_ref[...] = jnp.zeros_like(ss_ref)

    h = h_ref[...]
    ss_ref[...] += jnp.sum(h * h, axis=0, keepdims=True)


def _normalize_kernel(h_ref, ss_ref, o_ref):
    """F.normalize(dim=0): x / max(||col||, 1e-12) == x * rsqrt(max(ss, 1e-24))."""
    inv = lax.rsqrt(jnp.maximum(ss_ref[...], 1e-24))
    o_ref[...] = h_ref[...] * inv


# --------------------------- wrapper ----------------------------------------


def netfea_forward(x, edge_index, params, *, tile_n=256):
    """x: (N, node_feature) float32; edge_index: (2, E) int32."""
    n, f = x.shape
    w1, b1, w2, b2 = params["w1"], params["b1"], params["w2"], params["b2"]
    hid1, hid2 = w1.shape[1], w2.shape[1]

    # ---- glue: (A + I) and D^{-1/2} (plain JAX; never materialize dense a_hat) ----
    # TODO(synk): for very large edge sets build (A+I) via segment_sum instead of scatter.
    adj = jnp.zeros((n, n), jnp.float32)
    adj = adj.at[edge_index[0], edge_index[1]].set(1.0)
    adj = adj + jnp.eye(n, dtype=jnp.float32)  # add self loops
    deg = jnp.sum(adj, axis=1)
    d_inv_sqrt = jnp.where(deg > 0, lax.rsqrt(deg), 0.0)

    # ---- padding: lane-dense feature dims, tile-aligned node dim ----
    tn = min(tile_n, _round_up(n, 16))      # 16: bf16 sublane packing
    n_pad = _round_up(n, tn)
    f_pad = _round_up(f, 128)
    h1_pad = _round_up(hid1, 128)
    h2_pad = _round_up(hid2, 128)
    num_tiles = n_pad // tn

    # (A+I) is 0/1/2-valued -> exact in bf16; halves HBM traffic of the N^2 operand.
    adj_p = jnp.zeros((n_pad, n_pad), jnp.bfloat16).at[:n, :n].set(
        adj.astype(jnp.bfloat16))
    x_p = jnp.zeros((n_pad, f_pad), jnp.float32).at[:n, :f].set(x)
    d_p = jnp.zeros((n_pad, 1), jnp.float32).at[:n, 0].set(d_inv_sqrt)
    w1_p = jnp.zeros((f_pad, h1_pad), jnp.float32).at[:f, :hid1].set(w1)
    b1_p = jnp.zeros((1, h1_pad), jnp.float32).at[0, :hid1].set(b1)
    w2_p = jnp.zeros((h1_pad, h2_pad), jnp.float32).at[:hid1, :hid2].set(w2)
    b2_p = jnp.zeros((1, h2_pad), jnp.float32).at[0, :hid2].set(b2)

    grid = (num_tiles,)
    par = pltpu.CompilerParams(dimension_semantics=("parallel",))
    arb = pltpu.CompilerParams(dimension_semantics=("arbitrary",))

    def row_tile(cols):
        return pl.BlockSpec((tn, cols), lambda i: (i, 0))

    def resident(rows, cols):  # full array, stays resident across the grid
        return pl.BlockSpec((rows, cols), lambda i: (0, 0))

    d_spec = pl.BlockSpec((tn, 1), lambda i: (i, 0))

    # 1) Z1 = D^{-1/2} (X @ W1)
    z1 = pl.pallas_call(
        _transform_kernel,
        grid=grid,
        in_specs=[row_tile(f_pad), resident(f_pad, h1_pad), d_spec],
        out_specs=row_tile(h1_pad),
        out_shape=jax.ShapeDtypeStruct((n_pad, h1_pad), jnp.bfloat16),
        compiler_params=par,
    )(x_p, w1_p, d_p)

    # 2) layer-1 aggregation fused with the layer-2 feature transform
    z2 = pl.pallas_call(
        _layer1_fused_kernel,
        grid=grid,
        in_specs=[row_tile(n_pad), resident(n_pad, h1_pad), d_spec,
                  resident(1, h1_pad), resident(h1_pad, h2_pad)],
        out_specs=row_tile(h2_pad),
        out_shape=jax.ShapeDtypeStruct((n_pad, h2_pad), jnp.bfloat16),
        compiler_params=par,
    )(adj_p, z1, d_p, b1_p, w2_p)

    # 3) layer-2 aggregation -> H2 (f32, padded rows zeroed)
    h2 = pl.pallas_call(
        functools.partial(_layer2_kernel, tile_n=tn, n_valid=n),
        grid=grid,
        in_specs=[row_tile(n_pad), resident(n_pad, h2_pad), d_spec,
                  resident(1, h2_pad)],
        out_specs=row_tile(h2_pad),
        out_shape=jax.ShapeDtypeStruct((n_pad, h2_pad), jnp.float32),
        compiler_params=par,
    )(adj_p, z2, d_p, b2_p)

    # 4) per-column sum of squares (f32 accumulator across row tiles)
    ss = pl.pallas_call(
        _colsumsq_kernel,
        grid=grid,
        in_specs=[row_tile(h2_pad)],
        out_specs=pl.BlockSpec((1, h2_pad), lambda i: (0, 0)),
        out_shape=jax.ShapeDtypeStruct((1, h2_pad), jnp.float32),
        compiler_params=arb,
    )(h2)

    # 5) column-wise L2 normalize
    out_p = pl.pallas_call(
        _normalize_kernel,
        grid=grid,
        in_specs=[row_tile(h2_pad), pl.BlockSpec((1, h2_pad), lambda i: (0, 0))],
        out_specs=row_tile(h2_pad),
        out_shape=jax.ShapeDtypeStruct((n_pad, h2_pad), jnp.float32),
        compiler_params=par,
    )(h2, ss)

    return out_p[:n, :hid2]


def init_params(key, node_feature, hid1, hid2):
    k1, k2 = jax.random.split(key)
    w1 = jax.random.normal(k1, (node_feature, hid1), jnp.float32) * (
        1.0 / jnp.sqrt(jnp.float32(node_feature))
    )
    w2 = jax.random.normal(k2, (hid1, hid2), jnp.float32) * (
        1.0 / jnp.sqrt(jnp.float32(hid1))
    )
    b1 = jnp.zeros((hid1,), jnp.float32)
    b2 = jnp.zeros((hid2,), jnp.float32)
    return {"w1": w1, "b1": b1, "w2": w2, "b2": b2}


if __name__ == "__main__":
    key = jax.random.PRNGKey(0)
    k_x, k_p = jax.random.split(key)

    N, NODE_FEATURE, HID1, HID2 = 8, 16, 32, 32
    x = jax.random.normal(k_x, (N, NODE_FEATURE), jnp.float32)

    # small deterministic edge set (undirected, as two directed edges)
    src = jnp.array([0, 1, 2, 3, 4, 5, 6, 7, 0, 2], dtype=jnp.int32)
    dst = jnp.array([1, 2, 3, 4, 5, 6, 7, 0, 4, 6], dtype=jnp.int32)
    edge_index = jnp.stack(
        [jnp.concatenate([src, dst]), jnp.concatenate([dst, src])], axis=0
    )

    params = init_params(k_p, NODE_FEATURE, HID1, HID2)

    out = jax.block_until_ready(netfea_forward(x, edge_index, params))
    assert out.shape == (N, HID2)
    # columns should be (near) unit-norm after F.normalize(dim=0)
    col_norms = jnp.linalg.norm(out, axis=0)
    assert bool(jnp.all(jnp.abs(col_norms - 1.0) < 1e-3))
    print("KERNEL_OK")
</pallas_src>

<mosaic_0001>
module attributes {stable_mosaic.version = 11 : i64} {
  func.func @_transform_kernel(%arg0: i32, %arg1: memref<16x128xf32, #tpu.memory_space<vmem>>, %arg2: memref<128x128xf32, #tpu.memory_space<vmem>>, %arg3: memref<16x1xf32, #tpu.memory_space<vmem>>, %arg4: memref<16x128xbf16, #tpu.memory_space<vmem>>) attributes {dimension_semantics = [#tpu.dimension_semantics<parallel>], iteration_bounds = array<i64: 1>, scalar_prefetch = 0 : i64, scratch_operands = 0 : i64, tpu.core_type = #tpu.core_type<tc>, window_params = [{transform_indices = @transform_0, window_bounds = array<i64: 16, 128>}, {pipeline_mode = #tpu.pipeline_mode<synchronous>, transform_indices = @transform_1, window_bounds = array<i64: 128, 128>}, {transform_indices = @transform_2, window_bounds = array<i64: 16, 1>}, {transform_indices = @transform_3, window_bounds = array<i64: 16, 128>}]} {
    %c0 = arith.constant 0 : index
    %c0_0 = arith.constant 0 : index
    %0 = vector.load %arg1[%c0, %c0_0] : memref<16x128xf32, #tpu.memory_space<vmem>>, vector<16x128xf32>
    %c0_1 = arith.constant 0 : index
    %c0_2 = arith.constant 0 : index
    %1 = vector.load %arg2[%c0_1, %c0_2] : memref<128x128xf32, #tpu.memory_space<vmem>>, vector<128x128xf32>
    %cst = arith.constant dense<0.000000e+00> : vector<16x128xf32>
    %2 = tpu.matmul %0, %1, %cst {dimension_numbers = #tpu.dot_dimension_numbers<[1], [0], [0], [1], [0, 0, 1, 1], [], []>} : vector<16x128xf32>, vector<128x128xf32>, vector<16x128xf32> -> vector<16x128xf32>
    %c0_3 = arith.constant 0 : index
    %c0_4 = arith.constant 0 : index
    %3 = vector.load %arg3[%c0_3, %c0_4] : memref<16x1xf32, #tpu.memory_space<vmem>>, vector<16x1xf32>
    %4 = vector.broadcast %3 : vector<16x1xf32> to vector<16x128xf32>
    %5 = arith.mulf %4, %2 : vector<16x128xf32>
    %6 = arith.truncf %5 : vector<16x128xf32> to vector<16x128xbf16>
    %c0_5 = arith.constant 0 : index
    %c0_6 = arith.constant 0 : index
    %7 = vector.load %arg4[%c0_5, %c0_6] : memref<16x128xbf16, #tpu.memory_space<vmem>>, vector<16x128xbf16>
    tpu.vector_store %arg4[%c0_5, %c0_6], %6 {strides = array<i32>} : memref<16x128xbf16, #tpu.memory_space<vmem>>, vector<16x128xbf16>,
    return
  }
  func.func @transform_0(%arg0: i32) -> (i32, i32) {
    %c0_i32 = arith.constant 0 : i32
    %c0_i32_0 = arith.constant 0 : i32
    return %arg0, %c0_i32 : i32, i32
  }
  func.func @transform_1(%arg0: i32) -> (i32, i32) {
    %c0_i32 = arith.constant 0 : i32
    %c0_i32_0 = arith.constant 0 : i32
    %c0_i32_1 = arith.constant 0 : i32
    return %c0_i32, %c0_i32_0 : i32, i32
  }
  func.func @transform_2(%arg0: i32) -> (i32, i32) {
    %c0_i32 = arith.constant 0 : i32
    %c0_i32_0 = arith.constant 0 : i32
    return %arg0, %c0_i32 : i32, i32
  }
  func.func @transform_3(%arg0: i32) -> (i32, i32) {
    %c0_i32 = arith.constant 0 : i32
    %c0_i32_0 = arith.constant 0 : i32
    return %arg0, %c0_i32 : i32, i32
  }
}

</mosaic_0001>

<bundles_post_ra>
// kernel: tpu_custom_call.1
= control target key start
LH: loop header
LB: loop body
LE: loop exit
PB: predicated region body
PF: predicated region fallthrough
CT: control target
= control target key end

     0   :  { %8 = vsyncpa [#allocation3], 0  ;;  %s376_s0 = inlined_call_operand.vmem [shape: f32[16,128], index: 0, kind: input, shape index: {}]   ;;  %s377_s1 = inlined_call_operand.hbm [shape: f32[128,128], index: 1, kind: input, shape index: {}]   ;;  %s378_s2 = inlined_call_operand.vmem [shape: f32[16,1], index: 2, kind: input, shape index: {}]   ;;  %s379_s3 = inlined_call_operand.hbm [shape: bf16[16,128], index: 3, kind: output, shape index: {}]  }
   0x1   :  { %9 = vsyncpa [#allocation4], 0  ;;  %s313_s12 = smov [#allocation2]   ;;  %s265_s16 = scalar_lea.hbm %s377_s1, 2048 }
   0x2   :  { %s17_s13 = sshll.u32 %s313_s12, 4  ;;  %p266_p0 = scmp.ne.s32.totalorder %s377_s1, %s265_s16  ;;  %s18_s13 = int_to_ptr.vmem [resolvable:$true] %s17_s13 }
   0x3   :  { %p269_p1 = scmp.lt.u32.totalorder %s265_s16, %s377_s1 }
   0x5   :  { %p271_p2 = pnand %p269_p1, %p266_p0 }
   0x7   :  { %274 = shalt.err (!%p271_p2)
}
   0x8   :  { %s275_s21 = scalar_lea.vmem %s18_s13, 2048  ;;  %p280_p4 = scmp.lt.s32.totalorder %s18_s13, %s18_s13 }
   0x9   :  { %p276_p3 = scmp.ne.s32.totalorder %s18_s13, %s275_s21  ;;  %p281_p5 = scmp.lt.s32.totalorder %s275_s21, %s275_s21 }
   0xb   :  { %p282_p6 = por %p281_p5, %p280_p4 }
   0xd   :  { %p283_p7 = pnand %p282_p6, %p276_p3 }
   0xf   :  { %286 = shalt.err (!%p283_p7)
}
  0x10   :  { %s314_s22 = smov 128   ;;  %s315_s23 = smov 8  }
  0x11   :  { %23 = dma.hbm_to_vmem [thread:$0]  %s377_s1, 2048, %s18_s13, [#allocation3], %s314_s22, %s314_s22, %s315_s23  }
  0x12   :  { %309 = dma.done.wait [#allocation3], 2048  }
  0x13   :  { %310 = vsyncadd [#allocation3], 4294965248  ;;  %v316_v0 = vmov 0   ;;  %v31_v1 = vld [vmem:[#allocation2] sm:$0xff]  ;;  %v32_v2 = vld [vmem:[#allocation2 + $0x8] sm:$0xff]  ;;  %s317_s5 = smov [#allocation5]  }
  0x14   :  { %264 = vset.pattern.permute.xlu0 %v316_v0  ;;  %v33_v3 = vld [vmem:[#allocation2 + $0x10] sm:$0xff]  ;;  %v225_v4 = vpack.c.bf16 %v32_v2, %v31_v1  ;;  %v34_v5 = vld [vmem:[#allocation2 + $0x18] sm:$0xff]  ;;  %v35_v7 = vld [vmem:[#allocation2 + $0x20] sm:$0xff]  ;;  %s151_s6 = sshll.u32 %s317_s5, 4  ;;  %s152_s6 = int_to_ptr.vmem [resolvable:$true] %s151_s6 }
  0x15   :  { %v229_v6 = vpack.c.bf16 %v34_v5, %v33_v3  ;;  %v36_v8 = vld [vmem:[#allocation2 + $0x28] sm:$0xff]  ;;  %v29_v10 = vld [vmem:[%s376_s0] sm:$0xff]  ;;  %v37_v11 = vld [vmem:[#allocation2 + $0x30] sm:$0xff]  ;;  %s287_s7 = scalar_lea.vmem %s152_s6, 128  ;;  %p292_p9 = scmp.lt.s32.totalorder %s152_s6, %s152_s6 }
  0x16   :  { %226 = vmatprep.subr.bf16.mxu0 %v225_v4  ;;  %v233_v9 = vpack.c.bf16 %v36_v8, %v35_v7  ;;  %v38_v12 = vld [vmem:[#allocation2 + $0x38] sm:$0xff]  ;;  %222 = vmatprep.mubr.f32.mxu0 %v29_v10  ;;  %v122_v13 = vld [vmem:[%s378_s2] sm:$0xff]  ;;  %v123_v14 = vld [vmem:[%s378_s2 + $0x8] sm:$0xff]  ;;  %p288_p8 = scmp.ne.s32.totalorder %s152_s6, %s287_s7  ;;  %p293_p10 = scmp.lt.s32.totalorder %s287_s7, %s287_s7 }
  0x17   :  { %228 = vmatpush3.bf16.msra.mxu0 %v225_v4  ;;  %126 = vperm.xlu0 %264, %v122_v13   ;;  %v237_v15 = vpack.c.bf16 %v38_v12, %v37_v11  ;;  %v39_v16 = vld [vmem:[#allocation2 + $0x40] sm:$0xff]  ;;  %v40_v17 = vld [vmem:[#allocation2 + $0x48] sm:$0xff]  ;;  %v41_v19 = vld [vmem:[#allocation2 + $0x50] sm:$0xff] }
  0x18   :  { %230 = vmatprep.subr.bf16.mxu0 %v229_v6  ;;  %v241_v18 = vpack.c.bf16 %v40_v17, %v39_v16  ;;  %v42_v20 = vld [vmem:[#allocation2 + $0x58] sm:$0xff]  ;;  %v43_v22 = vld [vmem:[#allocation2 + $0x60] sm:$0xff]  ;;  %v44_v23 = vld [vmem:[#allocation2 + $0x68] sm:$0xff]  ;;  %p294_p11 = por %p293_p10, %p292_p9 }
  0x19   :  { %v245_v21 = vpack.c.bf16 %v42_v20, %v41_v19  ;;  %v249_v24 = vpack.c.bf16 %v44_v23, %v43_v22  ;;  %v45_v25 = vld [vmem:[#allocation2 + $0x70] sm:$0xff]  ;;  %v46_v26 = vld [vmem:[#allocation2 + $0x78] sm:$0xff]  ;;  %v30_v28 = vld [vmem:[%s376_s0 + $0x8] sm:$0xff] }
  0x1a   :  { %v253_v27 = vpack.c.bf16 %v46_v26, %v45_v25  ;;  %p295_p12 = pnand %p294_p11, %p288_p8 }
  0x1b   :  { %232 = vmatpush3.bf16.msra.mxu0 %v229_v6  ;;  %131 = vperm.xlu0 %264, %v123_v14  }
  0x1c   :  { %234 = vmatprep.subr.bf16.mxu0 %v233_v9 }
  0x1f   :  { %236 = vmatpush3.bf16.msra.mxu0 %v233_v9 }
  0x20   :  { %238 = vmatprep.subr.bf16.mxu0 %v237_v15 }
  0x23   :  { %240 = vmatpush3.bf16.msra.mxu0 %v237_v15 }
  0x24   :  { %242 = vmatprep.subr.bf16.mxu0 %v241_v18 }
  0x27   :  { %244 = vmatpush3.bf16.msra.mxu0 %v241_v18 }
  0x28   :  { %246 = vmatprep.subr.bf16.mxu0 %v245_v21 }
  0x2b   :  { %248 = vmatpush3.bf16.msra.mxu0 %v245_v21 }
  0x2c   :  { %250 = vmatprep.subr.bf16.mxu0 %v249_v24 }
  0x2f   :  { %252 = vmatpush3.bf16.msra.mxu0 %v249_v24 }
  0x30   :  { %254 = vmatprep.subr.bf16.mxu0 %v253_v27 }
  0x33   :  { %256 = vmatpush3.bf16.msra.mxu0 %v253_v27 }
  0x36   :  { %223 = vmatmul.mubr.f32.vlgmr.msra.gmra.mrb[0].mxu0 %v30_v28 }
  0x96   :  { %v127_v29 = vpop.permute.xlu0 %126 }
  0x9a   :  { %v132_v30 = vpop.permute.xlu0 %131 }
 0x109   :  { %v224_v31 = vpop.f32.mrb[0].mxu0 }
 0x10a   :  { %v135_v32 = vmul.f32 %v224_v31, %v132_v30  ;;  %v113_v33 = vpop.f32.mrb[1].mxu0 }
 0x10b   :  { %v134_v34 = vmul.f32 %v127_v29, %v113_v33 }
 0x10d   :  { %v170_v35 = vpack.c.bf16 %v135_v32, %v134_v34 }
 0x10f   :  { %171 = vst [vmem:[#allocation5] sm:$0xff] %v170_v35  }
 0x110   :  { %298 = shalt.err (!%p295_p12)
}
 0x111   :  { %s299_s9 = scalar_lea.hbm %s379_s3, 128 }
 0x112   :  { %p300_p13 = scmp.ne.s32.totalorder %s379_s3, %s299_s9  ;;  %p303_p0 = scmp.lt.u32.totalorder %s299_s9, %s379_s3 }
 0x114   :  { %p305_p1 = pnand %p303_p0, %p300_p13 }
 0x116   :  { %308 = shalt.err (!%p305_p1)
}
 0x117   :  { %s318_s14 = smov 64   ;;  %s319_s15 = smov 4  }
 0x118   :  { %157 = dma.vmem_to_hbm [thread:$0]  %s152_s6, 128, %s379_s3, [#allocation4], %s318_s14, %s318_s14, %s319_s15  }
 0x119   :  { %311 = dma.done.wait [#allocation4], 128  }
 0x11a   :  { %312 = vsyncadd [#allocation4], 4294967168 }
 0x11b   :  { %161 = vsyncpa [#allocation3], 1 }
 0x11c   :  { %162 = vsyncpa [#allocation4], 1 }

</bundles_post_ra>
